<compile_context>
chip_gen: v5e
topology: v5e:2x2
jax: 0.10.0
libtpu: 0.0.40
codegen_flags: <defaults>
</compile_context>

<pallas_src>
import functools
import math

import jax
import jax.numpy as jnp
from jax.experimental import pallas as pl
from jax.experimental.pallas import tpu as pltpu


def _round_up(x, m):
    return ((x + m - 1) // m) * m


# -----------------------------------------------------------------------------
# Pallas kernel: one (batch, M-tile) grid step of a 3x3 / stride-2 conv + bias
# + ReLU, computed as 4 shifted matmuls over the stride-2 phase layout.
#   x_ref: (Kp, Lb)       bf16  phase slab (K = 4*Cin zero-padded to Kp); lanes
#                               = flattened (out_row, out_col incl. 1 garbage
#                               column) positions plus a halo of Wq + 1.
#   w_ref: (4, Cout, Kp)  bf16  per-offset regrouped weights (grid-resident).
#   b_ref: (Cout, 1)      f32   bias (grid-resident).
#   o_ref: (Cout, Mt)     bf16/f32 lane-dense output tile.
# out[:, m] = relu(bias + sum_o w[o] @ x[:, m + off(o)]),
#   off = (0, 1, Wq, Wq+1) <-> (row, col) shifts (0,0),(0,1),(1,0),(1,1).
# -----------------------------------------------------------------------------
def _conv_stage_kernel(x_ref, w_ref, b_ref, o_ref, *, wq, chunk):
    cout, mt = o_ref.shape
    offs = (0, 1, wq, wq + 1)
    for base in range(0, mt, chunk):            # static, unrolled; bounds vreg use
        acc = jnp.zeros((cout, chunk), jnp.float32)
        for o in range(4):                      # 4 shifted MXU matmuls, f32 acc
            s = base + offs[o]
            acc = acc + jnp.dot(w_ref[o], x_ref[:, s:s + chunk],
                                preferred_element_type=jnp.float32)
        # f32 epilogue (v5e-safe), cast only in the store (bf16 intermediates).
        o_ref[:, base:base + chunk] = jnp.maximum(acc + b_ref[...], 0.0).astype(o_ref.dtype)


def conv3x3_s2_bias_relu(x_nchw, w_off, bias_col, pad_value, out_dtype):
    """3x3 conv, stride 2, pad 1, + bias + ReLU via in-kernel tap accumulation.

    x_nchw:   (B, Cin, H, W) activations (raw f32 pixels for the stem, bf16 after).
    w_off:    (4, Cout, Kp) bf16, Kp = round_up(4*Cin, 16);
              w_off[2a+cb, n, (2pr+pc)*Cin + c] = w[2a+pr, 2cb+pc, c, n] (0 if kh/kw > 2).
    bias_col: (Cout, 1) f32.
    pad_value: optional (Cin,) raw-input border value (the stem uses the
              normalization mean so the folded normalization stays exact).
    out_dtype: bf16 for intermediate-only stages, f32 for returned feature maps.
    """
    B, Cin, H, W = x_nchw.shape
    _, Cout, Kp = w_off.shape
    assert H % 2 == 0 and W % 2 == 0, "even spatial dims required per stage"
    Ho, Wo = H // 2, W // 2
    Hq, Wq = Ho + 1, Wo + 1

    # ---- single cheap re-layout pass (XLA-fused): pad + stride-2 phase split ----
    xp = jnp.pad(x_nchw.astype(jnp.float32), ((0, 0), (0, 0), (1, 1), (1, 1)))
    if pad_value is not None:
        hi = jnp.arange(H + 2)
        wi = jnp.arange(W + 2)
        border = ((hi[:, None] == 0) | (hi[:, None] == H + 1) |
                  (wi[None, :] == 0) | (wi[None, :] == W + 1))
        xp = jnp.where(border[None, None, :, :],
                       pad_value.astype(xp.dtype)[None, :, None, None], xp)
    phases = jnp.stack([xp[:, :, 0::2, 0::2], xp[:, :, 0::2, 1::2],
                        xp[:, :, 1::2, 0::2], xp[:, :, 1::2, 1::2]], axis=1)
    xflat = phases.reshape(B, 4 * Cin, Hq * Wq).astype(jnp.bfloat16)

    # ---- lane-dense M tiling (output positions = Ho * Wq, incl. 1 garbage col) ----
    M = Ho * Wq
    m128 = _round_up(M, 128)
    Mt = m128 if m128 <= 512 else min(2048, _round_up(m128, 512))
    chunk = min(Mt, 512)
    NT = -(-M // Mt)
    Mp = NT * Mt
    Lb = Mt + _round_up(Wq + 1, 128)               # tile + tap halo, multiple of 128
    Lneed = (NT - 1) * Mt + Lb
    xflat = jnp.pad(xflat, ((0, 0), (0, Kp - 4 * Cin), (0, Lneed - Hq * Wq)))
    # haloed windows so BlockSpec blocks never need to overlap: (B, NT, Kp, Lb)
    xwin = jnp.stack([xflat[:, :, t * Mt: t * Mt + Lb] for t in range(NT)], axis=1)

    out = pl.pallas_call(
        functools.partial(_conv_stage_kernel, wq=Wq, chunk=chunk),
        out_shape=jax.ShapeDtypeStruct((B, Cout, Mp), out_dtype),
        grid=(B, NT),
        in_specs=[
            pl.BlockSpec((None, None, Kp, Lb), lambda b, t: (b, t, 0, 0)),  # phase slab tile
            pl.BlockSpec((4, Cout, Kp), lambda b, t: (0, 0, 0)),            # weights (resident)
            pl.BlockSpec((Cout, 1), lambda b, t: (0, 0)),                   # bias (resident)
        ],
        out_specs=pl.BlockSpec((None, Cout, Mt), lambda b, t: (b, 0, t)),
        compiler_params=pltpu.CompilerParams(
            dimension_semantics=("parallel", "parallel"),  # no reduction axis; both TCs
            vmem_limit_bytes=32 * 1024 * 1024,             # ~2 MiB/step footprint, v7x-safe
        ),
    )(xwin, w_off, bias_col)

    # crop padded positions + the garbage column; this slice fuses into the next
    # stage's phase-split / the final feature-map cast on the XLA side.
    return out[:, :, :M].reshape(B, Cout, Ho, Wq)[:, :, :, :Wo]


# -----------------------------------------------------------------------------
# TimmBackbone equivalent
# -----------------------------------------------------------------------------
class TimmBackbonePallas:
    """Synthetic `features_only` backbone with TimmBackbone's forward semantics."""

    _STAGE_CHANNELS = (8, 16, 32, 64)   # stage i has reduction 2**(i+1)

    def __init__(self, out_ids=(2, 3), key=None):
        if key is None:
            key = jax.random.PRNGKey(0)

        first_reduction = 2                                   # stem stride
        ids_offset = int(math.log2(first_reduction))
        self.out_ids = list(out_ids)
        self.out_indices = [out_id - ids_offset for out_id in out_ids]
        self.out_sizes = [self._STAGE_CHANNELS[i] for i in self.out_indices]
        # timm's FeatureListNet prunes modules past the last requested index.
        self.num_stages = max(self.out_indices) + 1

        # normalization buffers (same defaults as the PyTorch module)
        self.in_norm_mean = jnp.array([0.485, 0.456, 0.406], jnp.float32)
        self.in_norm_std = jnp.array([0.229, 0.224, 0.225], jnp.float32)

        # deterministic raw conv parameters (HWIO, Kaiming-like scale)
        self.raw_params = []
        cin = 3
        for cout in self._STAGE_CHANNELS[:self.num_stages]:
            key, kw_key, kb_key = jax.random.split(key, 3)
            fan_in = 9 * cin
            w = jax.random.normal(kw_key, (3, 3, cin, cout), jnp.float32) * (2.0 / fan_in) ** 0.5
            b = 0.01 * jax.random.normal(kb_key, (cout,), jnp.float32)
            self.raw_params.append((w, b))
            cin = cout

        # kernel-ready parameters: fold (x - mean)/std into the stem (f32 math),
        # regroup the 9 taps by (row, col) output shift over the 4 stride-2 input
        # phases, pad K = 4*Cin to a multiple of 16, cast to bf16.
        self.stage_params = []
        for idx, (w, b) in enumerate(self.raw_params):
            w32 = w.astype(jnp.float32)
            b32 = b.astype(jnp.float32)
            if idx == 0:
                inv_std = 1.0 / self.in_norm_std
                w32 = w32 * inv_std[None, None, :, None]                     # w' = w / std
                b32 = b32 - jnp.einsum("hwcn,c->n", w32, self.in_norm_mean)  # b' = b - sum(w'*mean)
                pad_value = self.in_norm_mean                                # raw-image border = mean
            else:
                pad_value = None
            cin, cout = w32.shape[2], w32.shape[3]
            kp = _round_up(4 * cin, 16)
            w_off = jnp.zeros((4, cout, kp), jnp.float32)
            for a in (0, 1):                      # output-row shift
                for cb in (0, 1):                 # output-col shift
                    for pr in (0, 1):             # input-row phase
                        for pc in (0, 1):         # input-col phase
                            kh, kw = 2 * a + pr, 2 * cb + pc
                            if kh > 2 or kw > 2:
                                continue
                            p = 2 * pr + pc
                            w_off = w_off.at[2 * a + cb, :, p * cin:(p + 1) * cin].set(
                                jnp.transpose(w32[kh, kw], (1, 0)))
            self.stage_params.append((w_off.astype(jnp.bfloat16),
                                      b32.reshape(cout, 1), pad_value))

    def __call__(self, images_nchw):
        """images_nchw: (B, 3, H, W) float. Returns list of NCHW feature maps."""
        x = images_nchw.astype(jnp.float32)
        feat_maps = []
        for stage_idx, (w_off, bias_col, pad_value) in enumerate(self.stage_params):
            is_out = stage_idx in self.out_indices
            out_dtype = jnp.float32 if is_out else jnp.bfloat16   # bf16 intermediates
            x = conv3x3_s2_bias_relu(x, w_off, bias_col, pad_value, out_dtype)
            if is_out:
                feat_maps.append(x)      # already [batch, feat_size, fH, fW]
        return feat_maps


# -----------------------------------------------------------------------------
# Pure-JAX reference (explicit normalization + f32 convs) for validation.
# -----------------------------------------------------------------------------
def _reference_forward(backbone, images_nchw):
    mean = backbone.in_norm_mean[None, :, None, None]
    std = backbone.in_norm_std[None, :, None, None]
    x = (images_nchw.astype(jnp.float32) - mean) / std
    feats = []
    for idx, (w, b) in enumerate(backbone.raw_params):
        x = jax.lax.conv_general_dilated(
            x, w, window_strides=(2, 2), padding=((1, 1), (1, 1)),
            dimension_numbers=("NCHW", "HWIO", "NCHW"))
        x = jnp.maximum(x + b[None, :, None, None], 0.0)
        if idx in backbone.out_indices:
            feats.append(x)
    return feats


# -----------------------------------------------------------------------------
# Demo
# -----------------------------------------------------------------------------
if __name__ == "__main__":
    key = jax.random.PRNGKey(0)
    key, xkey = jax.random.split(key)

    B, C, H, W = 2, 3, 16, 16
    images = jax.random.uniform(xkey, (B, C, H, W), jnp.float32)  # pixel-like inputs in [0, 1)

    backbone = TimmBackbonePallas(out_ids=(2, 3), key=jax.random.PRNGKey(0))
    forward = jax.jit(lambda imgs: backbone(imgs))
    feat_maps = forward(images)
    feat_maps = [jax.block_until_ready(f) for f in feat_maps]

    # shape bookkeeping: out_ids (2, 3) -> reductions 4 and 8, channels out_sizes
    expected = [(B, backbone.out_sizes[0], H // 4, W // 4),
                (B, backbone.out_sizes[1], H // 8, W // 8)]
    got = [tuple(f.shape) for f in feat_maps]
    assert got == expected, f"got {got}, expected {expected}"
    assert all(bool(jnp.all(jnp.isfinite(f))) for f in feat_maps)

    # numerical check vs. f32 reference (bf16 MXU inputs + bf16 intermediates -> loose tol)
    refs = _reference_forward(backbone, images)
    for f, r in zip(feat_maps, refs):
        tol = 6e-2 * (1.0 + float(jnp.max(jnp.abs(r))))
        err = float(jnp.max(jnp.abs(f - r)))
        assert err < tol, f"max abs err {err} exceeds tol {tol}"

    print("KERNEL_OK")
</pallas_src>

<mosaic_0001>
module attributes {stable_mosaic.version = 11 : i64} {
  func.func @_conv_stage_kernel(%arg0: i32, %arg1: i32, %arg2: memref<1x1x16x256xbf16, #tpu.memory_space<vmem>>, %arg3: memref<4x8x16xbf16, #tpu.memory_space<vmem>>, %arg4: memref<8x1xf32, #tpu.memory_space<vmem>>, %arg5: memref<1x8x128xbf16, #tpu.memory_space<vmem>>) attributes {dimension_semantics = [#tpu.dimension_semantics<parallel>, #tpu.dimension_semantics<parallel>], iteration_bounds = array<i64: 2, 1>, scalar_prefetch = 0 : i64, scratch_operands = 0 : i64, tpu.core_type = #tpu.core_type<tc>, window_params = [{transform_indices = @transform_0, window_bounds = array<i64: 1, 1, 16, 256>}, {pipeline_mode = #tpu.pipeline_mode<synchronous>, transform_indices = @transform_1, window_bounds = array<i64: 4, 8, 16>}, {pipeline_mode = #tpu.pipeline_mode<synchronous>, transform_indices = @transform_2, window_bounds = array<i64: 8, 1>}, {transform_indices = @transform_3, window_bounds = array<i64: 1, 8, 128>}]} {
    %cst = arith.constant 0.000000e+00 : f32
    %0 = vector.broadcast %cst : f32 to vector<8x128xf32>
    %c0 = arith.constant 0 : index
    %c0_0 = arith.constant 0 : index
    %c0_1 = arith.constant 0 : index
    %1 = vector.load %arg3[%c0, %c0_0, %c0_1] : memref<4x8x16xbf16, #tpu.memory_space<vmem>>, vector<1x8x16xbf16>
    %2 = vector.shape_cast %1 : vector<1x8x16xbf16> to vector<8x16xbf16>
    %c0_2 = arith.constant 0 : index
    %c0_3 = arith.constant 0 : index
    %c0_4 = arith.constant 0 : index
    %c0_5 = arith.constant 0 : index
    %3 = vector.load %arg2[%c0_2, %c0_3, %c0_4, %c0_5] : memref<1x1x16x256xbf16, #tpu.memory_space<vmem>>, vector<1x1x16x128xbf16>
    %4 = vector.shape_cast %3 : vector<1x1x16x128xbf16> to vector<16x128xbf16>
    %cst_6 = arith.constant dense<0.000000e+00> : vector<8x128xf32>
    %5 = tpu.matmul %2, %4, %cst_6 {dimension_numbers = #tpu.dot_dimension_numbers<[1], [0], [0], [1], [0, 0, 1, 1], [], []>} : vector<8x16xbf16>, vector<16x128xbf16>, vector<8x128xf32> -> vector<8x128xf32>
    %6 = arith.addf %0, %5 : vector<8x128xf32>
    %c1 = arith.constant 1 : index
    %c0_7 = arith.constant 0 : index
    %c0_8 = arith.constant 0 : index
    %7 = vector.load %arg3[%c1, %c0_7, %c0_8] : memref<4x8x16xbf16, #tpu.memory_space<vmem>>, vector<1x8x16xbf16>
    %8 = vector.shape_cast %7 : vector<1x8x16xbf16> to vector<8x16xbf16>
    %c0_9 = arith.constant 0 : index
    %c0_10 = arith.constant 0 : index
    %c0_11 = arith.constant 0 : index
    %c1_12 = arith.constant 1 : index
    %9 = vector.load %arg2[%c0_9, %c0_10, %c0_11, %c1_12] : memref<1x1x16x256xbf16, #tpu.memory_space<vmem>>, vector<1x1x16x128xbf16>
    %10 = vector.shape_cast %9 : vector<1x1x16x128xbf16> to vector<16x128xbf16>
    %cst_13 = arith.constant dense<0.000000e+00> : vector<8x128xf32>
    %11 = tpu.matmul %8, %10, %cst_13 {dimension_numbers = #tpu.dot_dimension_numbers<[1], [0], [0], [1], [0, 0, 1, 1], [], []>} : vector<8x16xbf16>, vector<16x128xbf16>, vector<8x128xf32> -> vector<8x128xf32>
    %12 = arith.addf %6, %11 : vector<8x128xf32>
    %c2 = arith.constant 2 : index
    %c0_14 = arith.constant 0 : index
    %c0_15 = arith.constant 0 : index
    %13 = vector.load %arg3[%c2, %c0_14, %c0_15] : memref<4x8x16xbf16, #tpu.memory_space<vmem>>, vector<1x8x16xbf16>
    %14 = vector.shape_cast %13 : vector<1x8x16xbf16> to vector<8x16xbf16>
    %c0_16 = arith.constant 0 : index
    %c0_17 = arith.constant 0 : index
    %c0_18 = arith.constant 0 : index
    %c9 = arith.constant 9 : index
    %15 = vector.load %arg2[%c0_16, %c0_17, %c0_18, %c9] : memref<1x1x16x256xbf16, #tpu.memory_space<vmem>>, vector<1x1x16x128xbf16>
    %16 = vector.shape_cast %15 : vector<1x1x16x128xbf16> to vector<16x128xbf16>
    %cst_19 = arith.constant dense<0.000000e+00> : vector<8x128xf32>
    %17 = tpu.matmul %14, %16, %cst_19 {dimension_numbers = #tpu.dot_dimension_numbers<[1], [0], [0], [1], [0, 0, 1, 1], [], []>} : vector<8x16xbf16>, vector<16x128xbf16>, vector<8x128xf32> -> vector<8x128xf32>
    %18 = arith.addf %12, %17 : vector<8x128xf32>
    %c3 = arith.constant 3 : index
    %c0_20 = arith.constant 0 : index
    %c0_21 = arith.constant 0 : index
    %19 = vector.load %arg3[%c3, %c0_20, %c0_21] : memref<4x8x16xbf16, #tpu.memory_space<vmem>>, vector<1x8x16xbf16>
    %20 = vector.shape_cast %19 : vector<1x8x16xbf16> to vector<8x16xbf16>
    %c0_22 = arith.constant 0 : index
    %c0_23 = arith.constant 0 : index
    %c0_24 = arith.constant 0 : index
    %c10 = arith.constant 10 : index
    %21 = vector.load %arg2[%c0_22, %c0_23, %c0_24, %c10] : memref<1x1x16x256xbf16, #tpu.memory_space<vmem>>, vector<1x1x16x128xbf16>
    %22 = vector.shape_cast %21 : vector<1x1x16x128xbf16> to vector<16x128xbf16>
    %cst_25 = arith.constant dense<0.000000e+00> : vector<8x128xf32>
    %23 = tpu.matmul %20, %22, %cst_25 {dimension_numbers = #tpu.dot_dimension_numbers<[1], [0], [0], [1], [0, 0, 1, 1], [], []>} : vector<8x16xbf16>, vector<16x128xbf16>, vector<8x128xf32> -> vector<8x128xf32>
    %24 = arith.addf %18, %23 : vector<8x128xf32>
    %c0_26 = arith.constant 0 : index
    %c0_27 = arith.constant 0 : index
    %25 = vector.load %arg4[%c0_26, %c0_27] : memref<8x1xf32, #tpu.memory_space<vmem>>, vector<8x1xf32>
    %26 = vector.broadcast %25 : vector<8x1xf32> to vector<8x128xf32>
    %27 = arith.addf %24, %26 : vector<8x128xf32>
    %cst_28 = arith.constant 0.000000e+00 : f32
    %28 = vector.broadcast %cst_28 : f32 to vector<8x128xf32>
    %29 = arith.maximumf %27, %28 : vector<8x128xf32>
    %30 = arith.truncf %29 : vector<8x128xf32> to vector<8x128xbf16>
    %c0_29 = arith.constant 0 : index
    %c0_30 = arith.constant 0 : index
    %c0_31 = arith.constant 0 : index
    %31 = vector.load %arg5[%c0_29, %c0_30, %c0_31] : memref<1x8x128xbf16, #tpu.memory_space<vmem>>, vector<1x8x128xbf16>
    %32 = vector.shape_cast %31 : vector<1x8x128xbf16> to vector<8x128xbf16>
    %33 = vector.shape_cast %30 : vector<8x128xbf16> to vector<1x8x128xbf16>
    tpu.vector_store %arg5[%c0_29, %c0_30, %c0_31], %33 {strides = array<i32>} : memref<1x8x128xbf16, #tpu.memory_space<vmem>>, vector<1x8x128xbf16>,
    return
  }
  func.func @transform_0(%arg0: i32, %arg1: i32) -> (i32, i32, i32, i32) {
    %c0_i32 = arith.constant 0 : i32
    %c0_i32_0 = arith.constant 0 : i32
    %c0_i32_1 = arith.constant 0 : i32
    return %arg0, %arg1, %c0_i32, %c0_i32_0 : i32, i32, i32, i32
  }
  func.func @transform_1(%arg0: i32, %arg1: i32) -> (i32, i32, i32) {
    %c0_i32 = arith.constant 0 : i32
    %c0_i32_0 = arith.constant 0 : i32
    %c0_i32_1 = arith.constant 0 : i32
    %c0_i32_2 = arith.constant 0 : i32
    return %c0_i32, %c0_i32_0, %c0_i32_1 : i32, i32, i32
  }
  func.func @transform_2(%arg0: i32, %arg1: i32) -> (i32, i32) {
    %c0_i32 = arith.constant 0 : i32
    %c0_i32_0 = arith.constant 0 : i32
    %c0_i32_1 = arith.constant 0 : i32
    return %c0_i32, %c0_i32_0 : i32, i32
  }
  func.func @transform_3(%arg0: i32, %arg1: i32) -> (i32, i32, i32) {
    %c0_i32 = arith.constant 0 : i32
    %c0_i32_0 = arith.constant 0 : i32
    return %arg0, %c0_i32, %arg1 : i32, i32, i32
  }
}

module attributes {stable_mosaic.version = 11 : i64} {
  func.func @_conv_stage_kernel(%arg0: i32, %arg1: i32, %arg2: memref<1x1x32x256xbf16, #tpu.memory_space<vmem>>, %arg3: memref<4x16x32xbf16, #tpu.memory_space<vmem>>, %arg4: memref<16x1xf32, #tpu.memory_space<vmem>>, %arg5: memref<1x16x128xf32, #tpu.memory_space<vmem>>) attributes {dimension_semantics = [#tpu.dimension_semantics<parallel>, #tpu.dimension_semantics<parallel>], iteration_bounds = array<i64: 2, 1>, scalar_prefetch = 0 : i64, scratch_operands = 0 : i64, tpu.core_type = #tpu.core_type<tc>, window_params = [{transform_indices = @transform_0, window_bounds = array<i64: 1, 1, 32, 256>}, {pipeline_mode = #tpu.pipeline_mode<synchronous>, transform_indices = @transform_1, window_bounds = array<i64: 4, 16, 32>}, {pipeline_mode = #tpu.pipeline_mode<synchronous>, transform_indices = @transform_2, window_bounds = array<i64: 16, 1>}, {transform_indices = @transform_3, window_bounds = array<i64: 1, 16, 128>}]} {
    %cst = arith.constant 0.000000e+00 : f32
    %0 = vector.broadcast %cst : f32 to vector<16x128xf32>
    %c0 = arith.constant 0 : index
    %c0_0 = arith.constant 0 : index
    %c0_1 = arith.constant 0 : index
    %1 = vector.load %arg3[%c0, %c0_0, %c0_1] : memref<4x16x32xbf16, #tpu.memory_space<vmem>>, vector<1x16x32xbf16>
    %2 = vector.shape_cast %1 : vector<1x16x32xbf16> to vector<16x32xbf16>
    %c0_2 = arith.constant 0 : index
    %c0_3 = arith.constant 0 : index
    %c0_4 = arith.constant 0 : index
    %c0_5 = arith.constant 0 : index
    %3 = vector.load %arg2[%c0_2, %c0_3, %c0_4, %c0_5] : memref<1x1x32x256xbf16, #tpu.memory_space<vmem>>, vector<1x1x32x128xbf16>
    %4 = vector.shape_cast %3 : vector<1x1x32x128xbf16> to vector<32x128xbf16>
    %cst_6 = arith.constant dense<0.000000e+00> : vector<16x128xf32>
    %5 = tpu.matmul %2, %4, %cst_6 {dimension_numbers = #tpu.dot_dimension_numbers<[1], [0], [0], [1], [0, 0, 1, 1], [], []>} : vector<16x32xbf16>, vector<32x128xbf16>, vector<16x128xf32> -> vector<16x128xf32>
    %6 = arith.addf %0, %5 : vector<16x128xf32>
    %c1 = arith.constant 1 : index
    %c0_7 = arith.constant 0 : index
    %c0_8 = arith.constant 0 : index
    %7 = vector.load %arg3[%c1, %c0_7, %c0_8] : memref<4x16x32xbf16, #tpu.memory_space<vmem>>, vector<1x16x32xbf16>
    %8 = vector.shape_cast %7 : vector<1x16x32xbf16> to vector<16x32xbf16>
    %c0_9 = arith.constant 0 : index
    %c0_10 = arith.constant 0 : index
    %c0_11 = arith.constant 0 : index
    %c1_12 = arith.constant 1 : index
    %9 = vector.load %arg2[%c0_9, %c0_10, %c0_11, %c1_12] : memref<1x1x32x256xbf16, #tpu.memory_space<vmem>>, vector<1x1x32x128xbf16>
    %10 = vector.shape_cast %9 : vector<1x1x32x128xbf16> to vector<32x128xbf16>
    %cst_13 = arith.constant dense<0.000000e+00> : vector<16x128xf32>
    %11 = tpu.matmul %8, %10, %cst_13 {dimension_numbers = #tpu.dot_dimension_numbers<[1], [0], [0], [1], [0, 0, 1, 1], [], []>} : vector<16x32xbf16>, vector<32x128xbf16>, vector<16x128xf32> -> vector<16x128xf32>
    %12 = arith.addf %6, %11 : vector<16x128xf32>
    %c2 = arith.constant 2 : index
    %c0_14 = arith.constant 0 : index
    %c0_15 = arith.constant 0 : index
    %13 = vector.load %arg3[%c2, %c0_14, %c0_15] : memref<4x16x32xbf16, #tpu.memory_space<vmem>>, vector<1x16x32xbf16>
    %14 = vector.shape_cast %13 : vector<1x16x32xbf16> to vector<16x32xbf16>
    %c0_16 = arith.constant 0 : index
    %c0_17 = arith.constant 0 : index
    %c0_18 = arith.constant 0 : index
    %c5 = arith.constant 5 : index
    %15 = vector.load %arg2[%c0_16, %c0_17, %c0_18, %c5] : memref<1x1x32x256xbf16, #tpu.memory_space<vmem>>, vector<1x1x32x128xbf16>
    %16 = vector.shape_cast %15 : vector<1x1x32x128xbf16> to vector<32x128xbf16>
    %cst_19 = arith.constant dense<0.000000e+00> : vector<16x128xf32>
    %17 = tpu.matmul %14, %16, %cst_19 {dimension_numbers = #tpu.dot_dimension_numbers<[1], [0], [0], [1], [0, 0, 1, 1], [], []>} : vector<16x32xbf16>, vector<32x128xbf16>, vector<16x128xf32> -> vector<16x128xf32>
    %18 = arith.addf %12, %17 : vector<16x128xf32>
    %c3 = arith.constant 3 : index
    %c0_20 = arith.constant 0 : index
    %c0_21 = arith.constant 0 : index
    %19 = vector.load %arg3[%c3, %c0_20, %c0_21] : memref<4x16x32xbf16, #tpu.memory_space<vmem>>, vector<1x16x32xbf16>
    %20 = vector.shape_cast %19 : vector<1x16x32xbf16> to vector<16x32xbf16>
    %c0_22 = arith.constant 0 : index
    %c0_23 = arith.constant 0 : index
    %c0_24 = arith.constant 0 : index
    %c6 = arith.constant 6 : index
    %21 = vector.load %arg2[%c0_22, %c0_23, %c0_24, %c6] : memref<1x1x32x256xbf16, #tpu.memory_space<vmem>>, vector<1x1x32x128xbf16>
    %22 = vector.shape_cast %21 : vector<1x1x32x128xbf16> to vector<32x128xbf16>
    %cst_25 = arith.constant dense<0.000000e+00> : vector<16x128xf32>
    %23 = tpu.matmul %20, %22, %cst_25 {dimension_numbers = #tpu.dot_dimension_numbers<[1], [0], [0], [1], [0, 0, 1, 1], [], []>} : vector<16x32xbf16>, vector<32x128xbf16>, vector<16x128xf32> -> vector<16x128xf32>
    %24 = arith.addf %18, %23 : vector<16x128xf32>
    %c0_26 = arith.constant 0 : index
    %c0_27 = arith.constant 0 : index
    %25 = vector.load %arg4[%c0_26, %c0_27] : memref<16x1xf32, #tpu.memory_space<vmem>>, vector<16x1xf32>
    %26 = vector.broadcast %25 : vector<16x1xf32> to vector<16x128xf32>
    %27 = arith.addf %24, %26 : vector<16x128xf32>
    %cst_28 = arith.constant 0.000000e+00 : f32
    %28 = vector.broadcast %cst_28 : f32 to vector<16x128xf32>
    %29 = arith.maximumf %27, %28 : vector<16x128xf32>
    %c0_29 = arith.constant 0 : index
    %c0_30 = arith.constant 0 : index
    %c0_31 = arith.constant 0 : index
    %30 = vector.load %arg5[%c0_29, %c0_30, %c0_31] : memref<1x16x128xf32, #tpu.memory_space<vmem>>, vector<1x16x128xf32>
    %31 = vector.shape_cast %30 : vector<1x16x128xf32> to vector<16x128xf32>
    %32 = vector.shape_cast %29 : vector<16x128xf32> to vector<1x16x128xf32>
    tpu.vector_store %arg5[%c0_29, %c0_30, %c0_31], %32 {strides = array<i32>} : memref<1x16x128xf32, #tpu.memory_space<vmem>>, vector<1x16x128xf32>,
    return
  }
  func.func @transform_0(%arg0: i32, %arg1: i32) -> (i32, i32, i32, i32) {
    %c0_i32 = arith.constant 0 : i32
    %c0_i32_0 = arith.constant 0 : i32
    %c0_i32_1 = arith.constant 0 : i32
    return %arg0, %arg1, %c0_i32, %c0_i32_0 : i32, i32, i32, i32
  }
  func.func @transform_1(%arg0: i32, %arg1: i32) -> (i32, i32, i32) {
    %c0_i32 = arith.constant 0 : i32
    %c0_i32_0 = arith.constant 0 : i32
    %c0_i32_1 = arith.constant 0 : i32
    %c0_i32_2 = arith.constant 0 : i32
    return %c0_i32, %c0_i32_0, %c0_i32_1 : i32, i32, i32
  }
  func.func @transform_2(%arg0: i32, %arg1: i32) -> (i32, i32) {
    %c0_i32 = arith.constant 0 : i32
    %c0_i32_0 = arith.constant 0 : i32
    %c0_i32_1 = arith.constant 0 : i32
    return %c0_i32, %c0_i32_0 : i32, i32
  }
  func.func @transform_3(%arg0: i32, %arg1: i32) -> (i32, i32, i32) {
    %c0_i32 = arith.constant 0 : i32
    %c0_i32_0 = arith.constant 0 : i32
    return %arg0, %c0_i32, %arg1 : i32, i32, i32
  }
}

module attributes {stable_mosaic.version = 11 : i64} {
  func.func @_conv_stage_kernel(%arg0: i32, %arg1: i32, %arg2: memref<1x1x64x256xbf16, #tpu.memory_space<vmem>>, %arg3: memref<4x32x64xbf16, #tpu.memory_space<vmem>>, %arg4: memref<32x1xf32, #tpu.memory_space<vmem>>, %arg5: memref<1x32x128xf32, #tpu.memory_space<vmem>>) attributes {dimension_semantics = [#tpu.dimension_semantics<parallel>, #tpu.dimension_semantics<parallel>], iteration_bounds = array<i64: 2, 1>, scalar_prefetch = 0 : i64, scratch_operands = 0 : i64, tpu.core_type = #tpu.core_type<tc>, window_params = [{transform_indices = @transform_0, window_bounds = array<i64: 1, 1, 64, 256>}, {pipeline_mode = #tpu.pipeline_mode<synchronous>, transform_indices = @transform_1, window_bounds = array<i64: 4, 32, 64>}, {pipeline_mode = #tpu.pipeline_mode<synchronous>, transform_indices = @transform_2, window_bounds = array<i64: 32, 1>}, {transform_indices = @transform_3, window_bounds = array<i64: 1, 32, 128>}]} {
    %cst = arith.constant 0.000000e+00 : f32
    %0 = vector.broadcast %cst : f32 to vector<32x128xf32>
    %c0 = arith.constant 0 : index
    %c0_0 = arith.constant 0 : index
    %c0_1 = arith.constant 0 : index
    %1 = vector.load %arg3[%c0, %c0_0, %c0_1] : memref<4x32x64xbf16, #tpu.memory_space<vmem>>, vector<1x32x64xbf16>
    %2 = vector.shape_cast %1 : vector<1x32x64xbf16> to vector<32x64xbf16>
    %c0_2 = arith.constant 0 : index
    %c0_3 = arith.constant 0 : index
    %c0_4 = arith.constant 0 : index
    %c0_5 = arith.constant 0 : index
    %3 = vector.load %arg2[%c0_2, %c0_3, %c0_4, %c0_5] : memref<1x1x64x256xbf16, #tpu.memory_space<vmem>>, vector<1x1x64x128xbf16>
    %4 = vector.shape_cast %3 : vector<1x1x64x128xbf16> to vector<64x128xbf16>
    %cst_6 = arith.constant dense<0.000000e+00> : vector<32x128xf32>
    %5 = tpu.matmul %2, %4, %cst_6 {dimension_numbers = #tpu.dot_dimension_numbers<[1], [0], [0], [1], [0, 0, 1, 1], [], []>} : vector<32x64xbf16>, vector<64x128xbf16>, vector<32x128xf32> -> vector<32x128xf32>
    %6 = arith.addf %0, %5 : vector<32x128xf32>
    %c1 = arith.constant 1 : index
    %c0_7 = arith.constant 0 : index
    %c0_8 = arith.constant 0 : index
    %7 = vector.load %arg3[%c1, %c0_7, %c0_8] : memref<4x32x64xbf16, #tpu.memory_space<vmem>>, vector<1x32x64xbf16>
    %8 = vector.shape_cast %7 : vector<1x32x64xbf16> to vector<32x64xbf16>
    %c0_9 = arith.constant 0 : index
    %c0_10 = arith.constant 0 : index
    %c0_11 = arith.constant 0 : index
    %c1_12 = arith.constant 1 : index
    %9 = vector.load %arg2[%c0_9, %c0_10, %c0_11, %c1_12] : memref<1x1x64x256xbf16, #tpu.memory_space<vmem>>, vector<1x1x64x128xbf16>
    %10 = vector.shape_cast %9 : vector<1x1x64x128xbf16> to vector<64x128xbf16>
    %cst_13 = arith.constant dense<0.000000e+00> : vector<32x128xf32>
    %11 = tpu.matmul %8, %10, %cst_13 {dimension_numbers = #tpu.dot_dimension_numbers<[1], [0], [0], [1], [0, 0, 1, 1], [], []>} : vector<32x64xbf16>, vector<64x128xbf16>, vector<32x128xf32> -> vector<32x128xf32>
    %12 = arith.addf %6, %11 : vector<32x128xf32>
    %c2 = arith.constant 2 : index
    %c0_14 = arith.constant 0 : index
    %c0_15 = arith.constant 0 : index
    %13 = vector.load %arg3[%c2, %c0_14, %c0_15] : memref<4x32x64xbf16, #tpu.memory_space<vmem>>, vector<1x32x64xbf16>
    %14 = vector.shape_cast %13 : vector<1x32x64xbf16> to vector<32x64xbf16>
    %c0_16 = arith.constant 0 : index
    %c0_17 = arith.constant 0 : index
    %c0_18 = arith.constant 0 : index
    %c3 = arith.constant 3 : index
    %15 = vector.load %arg2[%c0_16, %c0_17, %c0_18, %c3] : memref<1x1x64x256xbf16, #tpu.memory_space<vmem>>, vector<1x1x64x128xbf16>
    %16 = vector.shape_cast %15 : vector<1x1x64x128xbf16> to vector<64x128xbf16>
    %cst_19 = arith.constant dense<0.000000e+00> : vector<32x128xf32>
    %17 = tpu.matmul %14, %16, %cst_19 {dimension_numbers = #tpu.dot_dimension_numbers<[1], [0], [0], [1], [0, 0, 1, 1], [], []>} : vector<32x64xbf16>, vector<64x128xbf16>, vector<32x128xf32> -> vector<32x128xf32>
    %18 = arith.addf %12, %17 : vector<32x128xf32>
    %c3_20 = arith.constant 3 : index
    %c0_21 = arith.constant 0 : index
    %c0_22 = arith.constant 0 : index
    %19 = vector.load %arg3[%c3_20, %c0_21, %c0_22] : memref<4x32x64xbf16, #tpu.memory_space<vmem>>, vector<1x32x64xbf16>
    %20 = vector.shape_cast %19 : vector<1x32x64xbf16> to vector<32x64xbf16>
    %c0_23 = arith.constant 0 : index
    %c0_24 = arith.constant 0 : index
    %c0_25 = arith.constant 0 : index
    %c4 = arith.constant 4 : index
    %21 = vector.load %arg2[%c0_23, %c0_24, %c0_25, %c4] : memref<1x1x64x256xbf16, #tpu.memory_space<vmem>>, vector<1x1x64x128xbf16>
    %22 = vector.shape_cast %21 : vector<1x1x64x128xbf16> to vector<64x128xbf16>
    %cst_26 = arith.constant dense<0.000000e+00> : vector<32x128xf32>
    %23 = tpu.matmul %20, %22, %cst_26 {dimension_numbers = #tpu.dot_dimension_numbers<[1], [0], [0], [1], [0, 0, 1, 1], [], []>} : vector<32x64xbf16>, vector<64x128xbf16>, vector<32x128xf32> -> vector<32x128xf32>
    %24 = arith.addf %18, %23 : vector<32x128xf32>
    %c0_27 = arith.constant 0 : index
    %c0_28 = arith.constant 0 : index
    %25 = vector.load %arg4[%c0_27, %c0_28] : memref<32x1xf32, #tpu.memory_space<vmem>>, vector<32x1xf32>
    %26 = vector.broadcast %25 : vector<32x1xf32> to vector<32x128xf32>
    %27 = arith.addf %24, %26 : vector<32x128xf32>
    %cst_29 = arith.constant 0.000000e+00 : f32
    %28 = vector.broadcast %cst_29 : f32 to vector<32x128xf32>
    %29 = arith.maximumf %27, %28 : vector<32x128xf32>
    %c0_30 = arith.constant 0 : index
    %c0_31 = arith.constant 0 : index
    %c0_32 = arith.constant 0 : index
    %30 = vector.load %arg5[%c0_30, %c0_31, %c0_32] : memref<1x32x128xf32, #tpu.memory_space<vmem>>, vector<1x32x128xf32>
    %31 = vector.shape_cast %30 : vector<1x32x128xf32> to vector<32x128xf32>
    %32 = vector.shape_cast %29 : vector<32x128xf32> to vector<1x32x128xf32>
    tpu.vector_store %arg5[%c0_30, %c0_31, %c0_32], %32 {strides = array<i32>} : memref<1x32x128xf32, #tpu.memory_space<vmem>>, vector<1x32x128xf32>,
    return
  }
  func.func @transform_0(%arg0: i32, %arg1: i32) -> (i32, i32, i32, i32) {
    %c0_i32 = arith.constant 0 : i32
    %c0_i32_0 = arith.constant 0 : i32
    %c0_i32_1 = arith.constant 0 : i32
    return %arg0, %arg1, %c0_i32, %c0_i32_0 : i32, i32, i32, i32
  }
  func.func @transform_1(%arg0: i32, %arg1: i32) -> (i32, i32, i32) {
    %c0_i32 = arith.constant 0 : i32
    %c0_i32_0 = arith.constant 0 : i32
    %c0_i32_1 = arith.constant 0 : i32
    %c0_i32_2 = arith.constant 0 : i32
    return %c0_i32, %c0_i32_0, %c0_i32_1 : i32, i32, i32
  }
  func.func @transform_2(%arg0: i32, %arg1: i32) -> (i32, i32) {
    %c0_i32 = arith.constant 0 : i32
    %c0_i32_0 = arith.constant 0 : i32
    %c0_i32_1 = arith.constant 0 : i32
    return %c0_i32, %c0_i32_0 : i32, i32
  }
  func.func @transform_3(%arg0: i32, %arg1: i32) -> (i32, i32, i32) {
    %c0_i32 = arith.constant 0 : i32
    %c0_i32_0 = arith.constant 0 : i32
    return %arg0, %c0_i32, %arg1 : i32, i32, i32
  }
}

</mosaic_0001>

<bundles_post_ra>
// kernel: _lambda_.3
= control target key start
LH: loop header
LB: loop body
LE: loop exit
PB: predicated region body
PF: predicated region fallthrough
CT: control target
= control target key end

     0   :  { %s517_s12 = smov 0   ;;  %s519_s13 = smov 0   ;;  %s573_s0 = inlined_call_operand.vmem [shape: bf16[2,1,16,256], index: 0, kind: input, shape index: {}]   ;;  %s574_s1 = inlined_call_operand.vmem [shape: bf16[4,8,16], index: 1, kind: input, shape index: {}]   ;;  %s575_s2 = inlined_call_operand.vmem [shape: f32[8,1], index: 2, kind: input, shape index: {}]   ;;  %s576_s3 = inlined_call_operand.vmem [shape: bf16[2,8,128], index: 3, kind: output, shape index: {}]  }
   0x1   :  { %s521_s14 = smov 0  }
   0x2 LB: > { %s25_s15 = sadd.s32 1, %s487_s13  ;;  %p411_p0 = scmp.ge.s32.totalorder %s491_s14, 1  ;;  %s491_s14 = sphi %s521_s14, %s13_s14   ;;  %s487_s13 = sphi %s519_s13, %s578_s13   ;;  %s483_s12 = sphi %s517_s12, %s577_s12  }
   0x3   : > { %p27_p1 = scmp.ge.s32.totalorder %s25_s15, 2  ;;  %p157_p2 = scmp.lt.s32.totalorder %s491_s14, 3 }
   0x5   : > { %s580_s15 = smov (%p27_p1, %s25_s15), 0  ;;  %p158_p3 = pnand %p411_p0, %p157_p2 }
   0x6   : > { %p187_p4 = scmp.lt.s32.totalorder (!%p158_p3), %s483_s12, 1  ;;  %s493_s20 = smov (!%p158_p3), 118  }
   0x7   : > { %161 = sbr.rel (%p158_p3) target bundleno = 288 (0x120), region = 32  ;;  %s494_s21 = smov (!%p158_p3), 119  }
   0x8   : > { %s495_s22 = smov (!%p158_p3), 127  }
   0xc   : > { %s582_s12 = smov (!%p187_p4, %s483_s12), 1  ;;  %vm226_vm0 = vcmask 130048   ;;  %v204_v9 = vld [vmem:[%s574_s1] sm:$0xf]  ;;  %v496_v12 = vmov 0   ;;  %vm223_vm1 = vcmask 1039360  }
   0xd   : > { %s436_s16 = sshll.u32 %s582_s12, 4  ;;  %v317_v11 = vld [vmem:[%s575_s2] sm:$0xff]  ;;  %468 = vset.pattern.permute.xlu0 %v496_v12  ;;  %vm271_vm2 = vcmask 973824   ;;  %vm297_vm3 = vcmask 965632   ;;  %v430_v22 = vld [vmem:[%s574_s1 + $0x8] sm:$0xf] }
   0xe   : > { %s195_s19 = scalar_lea.vmem %s573_s0, %s436_s16  ;;  %v415_v15 = vld [vmem:[%s574_s1 + $0x4] sm:$0xf]  ;;  %v432_v23 = vld [vmem:[%s574_s1 + $0xc] sm:$0xf]  ;;  %s414_s6 = sshll.u32 %s582_s12, 2 }
   0xf   : > { %v418_v0 = vld [vmem:[%s195_s19] sm:$0xf]  ;;  %v439_v1 = vld [vmem:[%s195_s19 + $0x4] sm:$0xf0]  ;;  %v438_v3 = vld [vmem:[%s195_s19 + $0x4] sm:$0xf]  ;;  %s202_s9 = scalar_lea.vmem %s576_s3, %s414_s6 }
  0x10   : > { %v419_v2 = vor.u32 %v439_v1, %v418_v0  ;;  %v420_v4 = vld [vmem:[%s195_s19 + $0x8] sm:$0xf0]  ;;  %v427_v6 = vld [vmem:[%s195_s19] sm:$0xf]  ;;  %v437_v7 = vld [vmem:[%s195_s19 + $0x4] sm:$0xf0] }
  0x11   : > { %v423_v5 = vor.u32 %v438_v3, %v420_v4  ;;  %v428_v8 = vor.u32 %v437_v7, %v427_v6 }
  0x12   : > { %293 = vrot.lane.b32.xlu1 %v419_v2, %s493_s20  ;;  %267 = vrot.lane.b32.xlu0 %v419_v2, %s494_s21 }
  0x13   : > { %219 = vrot.lane.b32.xlu2 %v419_v2, %s495_s22  ;;  %259 = vmatpush.bf16.msra.mxu1 %v428_v8 }
  0x16   : > { %429 = vmatmul.msk.bf16.vlgmr.msra.gmra.mxu1 %vm226_vm0, %v204_v9 }
  0x1a   : > { %295 = vrot.lane.b32.xlu1 %v423_v5, %s493_s20  ;;  %269 = vrot.lane.b32.xlu0 %v423_v5, %s494_s21 }
  0x1b   : > { %221 = vrot.lane.b32.xlu2 %v423_v5, %s495_s22 }
  0x22   : > { %320 = vperm.xlu0 %468, %v317_v11  }
  0x6d   : > { %v220_v10 = vpop.permute.xlu2 %219 }
  0x75   : > { %v222_v13 = vpop.permute.xlu2 %221 }
  0x76   : > { %v224_v14 = vsel %vm223_vm1, %v220_v10, %v222_v13 }
  0x77   : > { %237 = vmatpush.bf16.msra.mxu0 %v224_v14 }
  0x7a   : > { %424 = vmatmul.msk.bf16.vlgmr.msra.gmra.mxu0 %vm226_vm0, %v415_v15 }
  0x84   : > { %v294_v16 = vpop.permute.xlu1 %293  ;;  %v268_v17 = vpop.permute.xlu0 %267 }
  0x8c   : > { %v296_v18 = vpop.permute.xlu1 %295  ;;  %v270_v19 = vpop.permute.xlu0 %269 }
  0x8d   : > { %v272_v20 = vsel %vm271_vm2, %v268_v17, %v270_v19  ;;  %v298_v21 = vsel %vm297_vm3, %v294_v16, %v296_v18 }
  0x8e   : > { %284 = vmatpush.bf16.msra.mxu2 %v272_v20  ;;  %310 = vmatpush.bf16.msra.mxu3 %v298_v21 }
  0x91   : > { %431 = vmatmul.msk.bf16.vlgmr.msra.gmra.mxu2 %vm226_vm0, %v430_v22  ;;  %433 = vmatmul.msk.bf16.vlgmr.msra.gmra.mxu3 %vm226_vm0, %v432_v23 }
  0x93   : > { %v261_v24 = vpop.f32.mrf.mxu1 }
  0x94   : > { %v321_v32 = vpop.permute.xlu0 %320 }
  0x9b   : > { %v263_v25 = vpop.f32.mrf.mxu1 }
  0xf7   : > { %v239_v26 = vpop.f32.mrf.mxu0 }
  0xf8   : > { %v262_v28 = vadd.f32 %v261_v24, %v239_v26 }
  0xff   : > { %v241_v27 = vpop.f32.mrf.mxu0 }
 0x114   : > { %v286_v29 = vpop.f32.mrf.mxu2  ;;  %v312_v30 = vpop.f32.mrf.mxu3 }
 0x115   : > { %v290_v31 = vadd.f32 %v286_v29, %v262_v28 }
 0x117   : > { %v316_v33 = vadd.f32 %v312_v30, %v290_v31 }
 0x119   : > { %v323_v34 = vadd.f32 %v321_v32, %v316_v33 }
 0x11b   : > { %v324_v35 = vmax.f32 %v323_v34, 0.0 }
 0x11c   : > { %v288_v36 = vpop.f32.mrf.mxu2  ;;  %v314_v37 = vpop.f32.mrf.mxu3 }
 0x11d   : > { %v325_v38 = vpack.c.bf16 %v324_v35, %v324_v35 }
 0x11f   : > { %326 = vst [vmem:[%s202_s9] sm:$0xf] %v325_v38 }
 0x120 PF: > { %s13_s14 = sadd.s32 1, %s491_s14   ;;  %s577_s12 = smov %s487_s13 }
 0x121   : > { %p10_p5 = scmp.ge.s32.totalorder %s13_s14, 4   ;;  %s578_s13 = smov %s580_s15 }
 0x123   :  { %12 = sbr.rel (!%p10_p5) target bundleno = 2 (0x2), region = 65 }

// kernel: _lambda_.4
= control target key start
LH: loop header
LB: loop body
LE: loop exit
PB: predicated region body
PF: predicated region fallthrough
CT: control target
= control target key end

     0   :  { %s640_s12 = smov 0   ;;  %s642_s13 = smov 0   ;;  %s717_s0 = inlined_call_operand.vmem [shape: bf16[2,1,32,256], index: 0, kind: input, shape index: {}]   ;;  %s718_s1 = inlined_call_operand.vmem [shape: bf16[4,16,32], index: 1, kind: input, shape index: {}]   ;;  %s719_s2 = inlined_call_operand.vmem [shape: f32[16,1], index: 2, kind: input, shape index: {}]   ;;  %s720_s3 = inlined_call_operand.vmem [shape: f32[2,16,128], index: 3, kind: output, shape index: {}]  }
   0x1   :  { %s644_s14 = smov 0  }
   0x2 LB: > { %s25_s15 = sadd.s32 1, %s610_s13  ;;  %p493_p0 = scmp.ge.s32.totalorder %s614_s14, 1  ;;  %s614_s14 = sphi %s644_s14, %s13_s14   ;;  %s610_s13 = sphi %s642_s13, %s722_s13   ;;  %s606_s12 = sphi %s640_s12, %s721_s12  }
   0x3   : > { %p27_p1 = scmp.ge.s32.totalorder %s25_s15, 2  ;;  %p157_p2 = scmp.lt.s32.totalorder %s614_s14, 3 }
   0x5   : > { %s724_s15 = smov (%p27_p1, %s25_s15), 0  ;;  %p158_p3 = pnand %p493_p0, %p157_p2 }
   0x6   : > { %p188_p4 = scmp.lt.s32.totalorder (!%p158_p3), %s606_s12, 1  ;;  %s616_s20 = smov (!%p158_p3), 122  }
   0x7   : > { %161 = sbr.rel (%p158_p3) target bundleno = 308 (0x134), region = 32  ;;  %s617_s21 = smov (!%p158_p3), 123  }
   0x8   : > { %s618_s22 = smov (!%p158_p3), 127  }
   0xc   : > { %s726_s12 = smov (!%p188_p4, %s606_s12), 1  ;;  %vm248_vm0 = vcmask 1039360   ;;  %v552_v21 = vld [vmem:[%s718_s1] sm:$0xff]  ;;  %vm253_vm1 = vcmask 261120   ;;  %v386_v23 = vld [vmem:[%s719_s2 + $0x8] sm:$0xff]  ;;  %v619_v24 = vmov 0  }
   0xd   : > { %s550_s16 = sshll.u32 %s726_s12, 5  ;;  %v385_v22 = vld [vmem:[%s719_s2] sm:$0xff]  ;;  %590 = vset.pattern.permute.xlu0 %v619_v24  ;;  %591 = vset.pattern.permute.xlu1 %v619_v24  ;;  %vm321_vm2 = vcmask 1006592   ;;  %vm361_vm3 = vcmask 998400   ;;  %v560_v35 = vld [vmem:[%s718_s1 + $0x10] sm:$0xff]  ;;  %v555_v41 = vld [vmem:[%s718_s1 + $0x8] sm:$0xff] }
   0xe   : > { %s664_s19 = scalar_lea.vmem %s717_s0, %s550_s16  ;;  %v561_v42 = vld [vmem:[%s718_s1 + $0x18] sm:$0xff]  ;;  %s551_s8 = sshll.u32 %s726_s12, 4 }
   0xf   : > { %v514_v0 = vld [vmem:[%s664_s19 + $0x10] sm:$0xf]  ;;  %v559_v1 = vld [vmem:[%s664_s19 + $0x14] sm:$0xf0]  ;;  %v558_v3 = vld [vmem:[%s664_s19 + $0x14] sm:$0xf]  ;;  %s204_s11 = scalar_lea.vmem %s720_s3, %s551_s8 }
  0x10   : > { %v515_v2 = vor.u32 %v559_v1, %v514_v0  ;;  %v516_v4 = vld [vmem:[%s664_s19 + $0x18] sm:$0xf0]  ;;  %v506_v6 = vld [vmem:[%s664_s19] sm:$0xf]  ;;  %v557_v7 = vld [vmem:[%s664_s19 + $0x4] sm:$0xf0] }
  0x11   : > { %v519_v5 = vor.u32 %v558_v3, %v516_v4  ;;  %v556_v8 = vld [vmem:[%s664_s19 + $0x4] sm:$0xf]  ;;  %v508_v9 = vld [vmem:[%s664_s19 + $0x8] sm:$0xf0]  ;;  %v507_v10 = vor.u32 %v557_v7, %v506_v6  ;;  %v531_v13 = vld [vmem:[%s664_s19 + $0x10] sm:$0xf] }
  0x12   : > { %357 = vrot.lane.b32.xlu1 %v515_v2, %s616_s20  ;;  %317 = vrot.lane.b32.xlu0 %v515_v2, %s617_s21  ;;  %v511_v11 = vor.u32 %v556_v8, %v508_v9  ;;  %v554_v14 = vld [vmem:[%s664_s19 + $0x14] sm:$0xf0]  ;;  %v527_v17 = vld [vmem:[%s664_s19] sm:$0xf] }
  0x13   : > { %244 = vrot.lane.b32.xlu2 %v515_v2, %s618_s22  ;;  %v532_v15 = vor.u32 %v554_v14, %v531_v13  ;;  %v553_v18 = vld [vmem:[%s664_s19 + $0x4] sm:$0xf0] }
  0x14   : > { %v528_v20 = vor.u32 %v553_v18, %v527_v17 }
  0x15   : > { %297 = vmatpush.bf16.msra.mxu1 %v532_v15 }
  0x19   : > { %298 = vmatpush.bf16.msra.mxu1 %v528_v20 }
  0x1a   : > { %359 = vrot.lane.b32.xlu1 %v519_v5, %s616_s20  ;;  %319 = vrot.lane.b32.xlu0 %v519_v5, %s617_s21 }
  0x1b   : > { %246 = vrot.lane.b32.xlu2 %v519_v5, %s618_s22 }
  0x1c   : > { %533 = vmatmul.msk.bf16.vlgmr.msra.gmra.mxu1 %vm253_vm1, %v552_v21 }
  0x22   : > { %313 = vrot.lane.b32.xlu0 %v507_v10, %s617_s21  ;;  %315 = vrot.lane.b32.xlu1 %v511_v11, %s617_s21 }
  0x23   : > { %353 = vrot.lane.b32.xlu2 %v507_v10, %s616_s20 }
  0x2a   : > { %355 = vrot.lane.b32.xlu0 %v511_v11, %s616_s20  ;;  %240 = vrot.lane.b32.xlu1 %v507_v10, %s618_s22 }
  0x2b   : > { %242 = vrot.lane.b32.xlu2 %v511_v11, %s618_s22 }
  0x32   : > { %389 = vperm.xlu0 %590, %v385_v22   ;;  %394 = vperm.xlu1 %591, %v386_v23  }
  0x6d   : > { %v245_v12 = vpop.permute.xlu2 %244 }
  0x75   : > { %v247_v16 = vpop.permute.xlu2 %246 }
  0x76   : > { %v250_v19 = vsel %vm248_vm0, %v245_v12, %v247_v16 }
  0x77   : > { %263 = vmatpush.bf16.msra.mxu0 %v250_v19 }
  0x7d   : > { %v354_v31 = vpop.permute.xlu2 %353 }
  0x84   : > { %v358_v25 = vpop.permute.xlu1 %357  ;;  %v318_v26 = vpop.permute.xlu0 %317 }
  0x85   : > { %v243_v36 = vpop.permute.xlu2 %242 }
  0x8c   : > { %v360_v27 = vpop.permute.xlu1 %359  ;;  %v320_v28 = vpop.permute.xlu0 %319 }
  0x8d   : > { %v323_v29 = vsel %vm321_vm2, %v318_v26, %v320_v28  ;;  %v363_v30 = vsel %vm361_vm3, %v358_v25, %v360_v27 }
  0x8e   : > { %335 = vmatpush.bf16.msra.mxu2 %v323_v29  ;;  %375 = vmatpush.bf16.msra.mxu3 %v363_v30 }
  0x94   : > { %v314_v32 = vpop.permute.xlu0 %313  ;;  %v316_v33 = vpop.permute.xlu1 %315 }
  0x95   : > { %v322_v34 = vsel %vm321_vm2, %v314_v32, %v316_v33 }
  0x96   : > { %336 = vmatpush.bf16.msra.mxu2 %v322_v34 }
  0x99   : > { %540 = vmatmul.msk.bf16.vlgmr.msra.gmra.mxu2 %vm253_vm1, %v560_v35  ;;  %v300_v43 = vpop.f32.mrf.mxu1 }
  0x9c   : > { %v356_v37 = vpop.permute.xlu0 %355  ;;  %v241_v38 = vpop.permute.xlu1 %240 }
  0x9d   : > { %v249_v39 = vsel %vm248_vm0, %v241_v38, %v243_v36  ;;  %v362_v40 = vsel %vm361_vm3, %v354_v31, %v356_v37 }
  0x9e   : > { %264 = vmatpush.bf16.msra.mxu0 %v249_v39  ;;  %376 = vmatpush.bf16.msra.mxu3 %v362_v40 }
  0xa1   : > { %520 = vmatmul.msk.bf16.vlgmr.msra.gmra.mxu0 %vm253_vm1, %v555_v41  ;;  %547 = vmatmul.msk.bf16.vlgmr.msra.gmra.mxu3 %vm253_vm1, %v561_v42  ;;  %v302_v51 = vpop.f32.mrf.mxu1 }
  0xa4   : > { %v390_v49 = vpop.permute.xlu0 %389  ;;  %v395_v59 = vpop.permute.xlu1 %394 }
 0x11c   : > { %v338_v46 = vpop.f32.mrf.mxu2 }
 0x11e   : > { %v266_v44 = vpop.f32.mrf.mxu0 }
 0x11f   : > { %v301_v45 = vadd.f32 %v300_v43, %v266_v44 }
 0x121   : > { %v343_v47 = vadd.f32 %v338_v46, %v301_v45 }
 0x124   : > { %v378_v48 = vpop.f32.mrf.mxu3  ;;  %v340_v56 = vpop.f32.mrf.mxu2 }
 0x125   : > { %v383_v50 = vadd.f32 %v378_v48, %v343_v47 }
 0x126   : > { %v268_v52 = vpop.f32.mrf.mxu0 }
 0x127   : > { %v397_v53 = vadd.f32 %v390_v49, %v383_v50  ;;  %v303_v54 = vadd.f32 %v302_v51, %v268_v52 }
 0x129   : > { %v399_v55 = vmax.f32 %v397_v53, 0.0  ;;  %v344_v57 = vadd.f32 %v340_v56, %v303_v54 }
 0x12b   : > { %401 = vst [vmem:[%s204_s11] sm:$0xff] %v399_v55 }
 0x12c   : > { %v380_v58 = vpop.f32.mrf.mxu3 }
 0x12d   : > { %v384_v60 = vadd.f32 %v380_v58, %v344_v57 }
 0x12f   : > { %v398_v61 = vadd.f32 %v395_v59, %v384_v60 }
 0x131   : > { %v400_v62 = vmax.f32 %v398_v61, 0.0 }
 0x133   : > { %402 = vst [vmem:[%s204_s11 + $0x8] sm:$0xff] %v400_v62 }
 0x134 PF: > { %s13_s14 = sadd.s32 1, %s614_s14   ;;  %s721_s12 = smov %s610_s13 }
 0x135   : > { %p10_p5 = scmp.ge.s32.totalorder %s13_s14, 4   ;;  %s722_s13 = smov %s724_s15 }
 0x137   :  { %12 = sbr.rel (!%p10_p5) target bundleno = 2 (0x2), region = 65 }

// kernel: _lambda_.5
= control target key start
LH: loop header
LB: loop body
LE: loop exit
PB: predicated region body
PF: predicated region fallthrough
CT: control target
= control target key end

     0   :  { %s855_s12 = smov 0   ;;  %s857_s13 = smov 0   ;;  %s1004_s0 = inlined_call_operand.vmem [shape: bf16[2,1,64,256], index: 0, kind: input, shape index: {}]   ;;  %s1005_s1 = inlined_call_operand.vmem [shape: bf16[4,32,64], index: 1, kind: input, shape index: {}]   ;;  %s1006_s2 = inlined_call_operand.vmem [shape: f32[32,1], index: 2, kind: input, shape index: {}]   ;;  %s1007_s3 = inlined_call_operand.vmem [shape: f32[2,32,128], index: 3, kind: output, shape index: {}]  }
   0x1   :  { %s859_s14 = smov 0  }
   0x2 LB: > { %s25_s15 = sadd.s32 1, %s825_s13  ;;  %p647_p0 = scmp.ge.s32.totalorder %s829_s14, 1  ;;  %s829_s14 = sphi %s859_s14, %s13_s14   ;;  %s825_s13 = sphi %s857_s13, %s1009_s13   ;;  %s821_s12 = sphi %s855_s12, %s1008_s12  }
   0x3   : > { %p27_p1 = scmp.ge.s32.totalorder %s25_s15, 2  ;;  %p157_p2 = scmp.lt.s32.totalorder %s829_s14, 3 }
   0x5   : > { %s1011_s15 = smov (%p27_p1, %s25_s15), 0  ;;  %p158_p3 = pnand %p647_p0, %p157_p2 }
   0x6   : > { %p188_p4 = scmp.lt.s32.totalorder (!%p158_p3), %s821_s12, 1  ;;  %s831_s20 = smov (!%p158_p3), 124  }
   0x7   : > { %161 = sbr.rel (%p158_p3) target bundleno = 356 (0x164), region = 32  ;;  %s832_s21 = smov (!%p158_p3), 125  }
   0x8   : > { %s833_s22 = smov (!%p158_p3), 127  }
   0xc   : > { %s1013_s12 = smov (!%p188_p4, %s821_s12), 1  ;;  %vm289_vm0 = vcmask 1039360   ;;  %vm414_vm1 = vcmask 1022976   ;;  %vm483_vm2 = vcmask 1014784   ;;  %v756_v50 = vld [vmem:[%s1005_s1] sm:$0xff]  ;;  %vm298_vm3 = vcmask 523264  }
   0xd   : > { %s754_s16 = sshll.u32 %s1013_s12, 6  ;;  %v757_v60 = vld [vmem:[%s1005_s1 + $0x8] sm:$0xff]  ;;  %s755_s24 = sshll.u32 %s1013_s12, 5 }
   0xe   : > { %s879_s19 = scalar_lea.vmem %s1004_s0, %s754_s16  ;;  %s989_s27 = scalar_lea.vmem %s1007_s3, %s755_s24 }
   0xf   : > { %v690_v0 = vld [vmem:[%s879_s19 + $0x30] sm:$0xf]  ;;  %v771_v1 = vld [vmem:[%s879_s19 + $0x34] sm:$0xf0]  ;;  %v770_v3 = vld [vmem:[%s879_s19 + $0x34] sm:$0xf] }
  0x10   : > { %v691_v2 = vor.u32 %v771_v1, %v690_v0  ;;  %v692_v4 = vld [vmem:[%s879_s19 + $0x38] sm:$0xf0]  ;;  %v682_v6 = vld [vmem:[%s879_s19 + $0x20] sm:$0xf]  ;;  %v769_v7 = vld [vmem:[%s879_s19 + $0x24] sm:$0xf0] }
  0x11   : > { %v695_v5 = vor.u32 %v770_v3, %v692_v4  ;;  %v768_v8 = vld [vmem:[%s879_s19 + $0x24] sm:$0xf]  ;;  %v684_v9 = vld [vmem:[%s879_s19 + $0x28] sm:$0xf0]  ;;  %v683_v10 = vor.u32 %v769_v7, %v682_v6  ;;  %v674_v12 = vld [vmem:[%s879_s19 + $0x10] sm:$0xf] }
  0x12   : > { %479 = vrot.lane.b32.xlu1 %v691_v2, %s831_s20  ;;  %410 = vrot.lane.b32.xlu0 %v691_v2, %s832_s21  ;;  %v687_v11 = vor.u32 %v768_v8, %v684_v9  ;;  %v767_v13 = vld [vmem:[%s879_s19 + $0x14] sm:$0xf0]  ;;  %v766_v14 = vld [vmem:[%s879_s19 + $0x14] sm:$0xf]  ;;  %v834_v4 = vmov 0  }
  0x13   : > { %285 = vrot.lane.b32.xlu2 %v691_v2, %s833_s22  ;;  %v676_v15 = vld [vmem:[%s879_s19 + $0x18] sm:$0xf0]  ;;  %v675_v16 = vor.u32 %v767_v13, %v674_v12  ;;  %v666_v18 = vld [vmem:[%s879_s19] sm:$0xf]  ;;  %v765_v19 = vld [vmem:[%s879_s19 + $0x4] sm:$0xf0]  ;;  %804 = vset.pattern.permute.xlu0 %v834_v4 }
  0x14   : > { %v679_v17 = vor.u32 %v766_v14, %v676_v15  ;;  %v764_v20 = vld [vmem:[%s879_s19 + $0x4] sm:$0xf]  ;;  %v668_v21 = vld [vmem:[%s879_s19 + $0x8] sm:$0xf0]  ;;  %v667_v22 = vor.u32 %v765_v19, %v666_v18  ;;  %v720_v30 = vld [vmem:[%s879_s19 + $0x30] sm:$0xf]  ;;  %805 = vset.pattern.permute.xlu1 %v834_v4  ;;  %806 = vset.pattern.permute.xlu2 %v834_v4 }
  0x15   : > { %v671_v23 = vor.u32 %v764_v20, %v668_v21  ;;  %v761_v31 = vld [vmem:[%s879_s19 + $0x34] sm:$0xf0]  ;;  %v716_v37 = vld [vmem:[%s879_s19 + $0x20] sm:$0xf]  ;;  %v760_v38 = vld [vmem:[%s879_s19 + $0x24] sm:$0xf0] }
  0x16   : > { %v721_v32 = vor.u32 %v761_v31, %v720_v30  ;;  %v717_v39 = vor.u32 %v760_v38, %v716_v37  ;;  %v712_v41 = vld [vmem:[%s879_s19 + $0x10] sm:$0xf]  ;;  %v759_v42 = vld [vmem:[%s879_s19 + $0x14] sm:$0xf0]  ;;  %v708_v47 = vld [vmem:[%s879_s19] sm:$0xf] }
  0x17   : > { %v713_v43 = vor.u32 %v759_v42, %v712_v41  ;;  %v758_v48 = vld [vmem:[%s879_s19 + $0x4] sm:$0xf0]  ;;  %v521_v2 = vld [vmem:[%s1006_s2] sm:$0xff]  ;;  %v763_v19 = vld [vmem:[%s1005_s1 + $0x18] sm:$0xff] }
  0x18   : > { %368 = vmatpush.bf16.msra.mxu1 %v721_v32  ;;  %v709_v49 = vor.u32 %v758_v48, %v708_v47  ;;  %v522_v3 = vld [vmem:[%s1006_s2 + $0x8] sm:$0xff]  ;;  %v772_v9 = vld [vmem:[%s1005_s1 + $0x20] sm:$0xff]  ;;  %v775_v20 = vld [vmem:[%s1005_s1 + $0x38] sm:$0xff] }
  0x19   : > { %v773_v18 = vld [vmem:[%s1005_s1 + $0x28] sm:$0xff] }
  0x1a   : > { %481 = vrot.lane.b32.xlu1 %v695_v5, %s831_s20  ;;  %412 = vrot.lane.b32.xlu0 %v695_v5, %s832_s21 }
  0x1b   : > { %287 = vrot.lane.b32.xlu2 %v695_v5, %s833_s22  ;;  %v523_v5 = vld [vmem:[%s1006_s2 + $0x10] sm:$0xff] }
  0x1c   : > { %369 = vmatpush.bf16.msra.mxu1 %v717_v39 }
  0x20   : > { %370 = vmatpush.bf16.msra.mxu1 %v713_v43 }
  0x22   : > { %406 = vrot.lane.b32.xlu0 %v683_v10, %s832_s21  ;;  %408 = vrot.lane.b32.xlu1 %v687_v11, %s832_s21 }
  0x23   : > { %475 = vrot.lane.b32.xlu2 %v683_v10, %s831_s20 }
  0x24   : > { %371 = vmatpush.bf16.msra.mxu1 %v709_v49 }
  0x27   : > { %722 = vmatmul.msk.bf16.vlgmr.msra.gmra.mxu1 %vm298_vm3, %v756_v50 }
  0x2a   : > { %477 = vrot.lane.b32.xlu0 %v687_v11, %s831_s20  ;;  %281 = vrot.lane.b32.xlu1 %v683_v10, %s833_s22  ;;  %v524_v10 = vld [vmem:[%s1006_s2 + $0x18] sm:$0xff] }
  0x2b   : > { %283 = vrot.lane.b32.xlu2 %v687_v11, %s833_s22 }
  0x32   : > { %402 = vrot.lane.b32.xlu0 %v675_v16, %s832_s21  ;;  %404 = vrot.lane.b32.xlu1 %v679_v17, %s832_s21 }
  0x33   : > { %471 = vrot.lane.b32.xlu2 %v675_v16, %s831_s20 }
  0x37   : > { %723 = vmatmul.msk.bf16.gmra.mxu1 %vm298_vm3, %v757_v60 }
  0x3a   : > { %473 = vrot.lane.b32.xlu0 %v679_v17, %s831_s20  ;;  %277 = vrot.lane.b32.xlu1 %v675_v16, %s833_s22  ;;  %v762_v16 = vld [vmem:[%s1005_s1 + $0x10] sm:$0xff] }
  0x3b   : > { %279 = vrot.lane.b32.xlu2 %v679_v17, %s833_s22  ;;  %v774_v17 = vld [vmem:[%s1005_s1 + $0x30] sm:$0xff] }
  0x42   : > { %398 = vrot.lane.b32.xlu0 %v667_v22, %s832_s21  ;;  %400 = vrot.lane.b32.xlu1 %v671_v23, %s832_s21 }
  0x43   : > { %467 = vrot.lane.b32.xlu2 %v667_v22, %s831_s20 }
  0x4a   : > { %469 = vrot.lane.b32.xlu0 %v671_v23, %s831_s20  ;;  %273 = vrot.lane.b32.xlu1 %v667_v22, %s833_s22 }
  0x4b   : > { %275 = vrot.lane.b32.xlu2 %v671_v23, %s833_s22 }
  0x52   : > { %527 = vperm.xlu0 %804, %v521_v2   ;;  %532 = vperm.xlu1 %805, %v522_v3  }
  0x53   : > { %537 = vperm.xlu2 %806, %v523_v5  }
  0x5a   : > { %542 = vperm.xlu1 %805, %v524_v10  }
  0x6d   : > { %v286_v24 = vpop.permute.xlu2 %285 }
  0x75   : > { %v288_v25 = vpop.permute.xlu2 %287 }
  0x76   : > { %v293_v26 = vsel %vm289_vm0, %v286_v24, %v288_v25 }
  0x77   : > { %309 = vmatpush.bf16.msra.mxu0 %v293_v26 }
  0x7d   : > { %v476_v29 = vpop.permute.xlu2 %475 }
  0x84   : > { %v480_v27 = vpop.permute.xlu1 %479  ;;  %v411_v28 = vpop.permute.xlu0 %410 }
  0x85   : > { %v284_v40 = vpop.permute.xlu2 %283 }
  0x8c   : > { %v482_v33 = vpop.permute.xlu1 %481  ;;  %v413_v34 = vpop.permute.xlu0 %412 }
  0x8d   : > { %v418_v35 = vsel %vm414_vm1, %v411_v28, %v413_v34  ;;  %v487_v36 = vsel %vm483_vm2, %v480_v27, %v482_v33  ;;  %v472_v51 = vpop.permute.xlu2 %471 }
  0x8e   : > { %433 = vmatpush.bf16.msra.mxu2 %v418_v35  ;;  %502 = vmatpush.bf16.msra.mxu3 %v487_v36 }
  0x94   : > { %v407_v44 = vpop.permute.xlu0 %406  ;;  %v409_v45 = vpop.permute.xlu1 %408 }
  0x95   : > { %v417_v46 = vsel %vm414_vm1, %v407_v44, %v409_v45  ;;  %v280_v59 = vpop.permute.xlu2 %279 }
  0x96   : > { %434 = vmatpush.bf16.msra.mxu2 %v417_v46 }
  0x9c   : > { %v478_v52 = vpop.permute.xlu0 %477  ;;  %v282_v53 = vpop.permute.xlu1 %281 }
  0x9d   : > { %v486_v54 = vsel %vm483_vm2, %v476_v29, %v478_v52  ;;  %v292_v55 = vsel %vm289_vm0, %v282_v53, %v284_v40  ;;  %v468_v1 = vpop.permute.xlu2 %467 }
  0x9e   : > { %503 = vmatpush.bf16.msra.mxu3 %v486_v54  ;;  %310 = vmatpush.bf16.msra.mxu0 %v292_v55 }
  0xa4   : > { %v403_v56 = vpop.permute.xlu0 %402  ;;  %v405_v57 = vpop.permute.xlu1 %404 }
  0xa5   : > { %v416_v58 = vsel %vm414_vm1, %v403_v56, %v405_v57  ;;  %v276_v11 = vpop.permute.xlu2 %275  ;;  %v373_v21 = vpop.f32.mrf.mxu1 }
  0xa6   : > { %435 = vmatpush.bf16.msra.mxu2 %v416_v58 }
  0xac   : > { %v474_v61 = vpop.permute.xlu0 %473  ;;  %v278_v62 = vpop.permute.xlu1 %277 }
  0xad   : > { %v485_v63 = vsel %vm483_vm2, %v472_v51, %v474_v61  ;;  %v291_v0 = vsel %vm289_vm0, %v278_v62, %v280_v59  ;;  %v375_v25 = vpop.f32.mrf.mxu1  ;;  %v538_v47 = vpop.permute.xlu2 %537 }
  0xae   : > { %504 = vmatpush.bf16.msra.mxu3 %v485_v63  ;;  %311 = vmatpush.bf16.msra.mxu0 %v291_v0 }
  0xb4   : > { %v399_v6 = vpop.permute.xlu0 %398  ;;  %v401_v7 = vpop.permute.xlu1 %400 }
  0xb5   : > { %v415_v8 = vsel %vm414_vm1, %v399_v6, %v401_v7  ;;  %v378_v35 = vpop.f32.mrf.mxu1 }
  0xb6   : > { %436 = vmatpush.bf16.msra.mxu2 %v415_v8 }
  0xb9   : > { %736 = vmatmul.msk.bf16.vlgmr.msra.gmra.mxu2 %vm298_vm3, %v772_v9 }
  0xbc   : > { %v470_v12 = vpop.permute.xlu0 %469  ;;  %v274_v13 = vpop.permute.xlu1 %273 }
  0xbd   : > { %v290_v14 = vsel %vm289_vm0, %v274_v13, %v276_v11  ;;  %v484_v15 = vsel %vm483_vm2, %v468_v1, %v470_v12  ;;  %v380_v49 = vpop.f32.mrf.mxu1 }
  0xbe   : > { %312 = vmatpush.bf16.msra.mxu0 %v290_v14  ;;  %505 = vmatpush.bf16.msra.mxu3 %v484_v15 }
  0xc1   : > { %696 = vmatmul.msk.bf16.vlgmr.msra.gmra.mxu0 %vm298_vm3, %v762_v16  ;;  %750 = vmatmul.msk.bf16.vlgmr.msra.gmra.mxu3 %vm298_vm3, %v774_v17 }
  0xc4   : > { %v528_v28 = vpop.permute.xlu0 %527  ;;  %v533_v38 = vpop.permute.xlu1 %532 }
  0xc9   : > { %737 = vmatmul.msk.bf16.gmra.mxu2 %vm298_vm3, %v773_v18 }
  0xcc   : > { %v543_v58 = vpop.permute.xlu1 %542 }
  0xd1   : > { %697 = vmatmul.msk.bf16.gmra.mxu0 %vm298_vm3, %v763_v19  ;;  %751 = vmatmul.msk.bf16.gmra.mxu3 %vm298_vm3, %v775_v20 }
 0x13c   : > { %v438_v22 = vpop.f32.mrf.mxu2 }
 0x13e   : > { %v314_v23 = vpop.f32.mrf.mxu0 }
 0x13f   : > { %v374_v24 = vadd.f32 %v373_v21, %v314_v23 }
 0x141   : > { %v448_v26 = vadd.f32 %v438_v22, %v374_v24 }
 0x144   : > { %v507_v27 = vpop.f32.mrf.mxu3  ;;  %v440_v30 = vpop.f32.mrf.mxu2 }
 0x145   : > { %v517_v29 = vadd.f32 %v507_v27, %v448_v26 }
 0x146   : > { %v316_v31 = vpop.f32.mrf.mxu0 }
 0x147   : > { %v545_v32 = vadd.f32 %v528_v28, %v517_v29  ;;  %v376_v33 = vadd.f32 %v375_v25, %v316_v31 }
 0x149   : > { %v549_v34 = vmax.f32 %v545_v32, 0.0  ;;  %v449_v36 = vadd.f32 %v440_v30, %v376_v33 }
 0x14b   : > { %553 = vst [vmem:[%s989_s27] sm:$0xff] %v549_v34 }
 0x14c   : > { %v509_v37 = vpop.f32.mrf.mxu3  ;;  %v443_v43 = vpop.f32.mrf.mxu2 }
 0x14d   : > { %v518_v39 = vadd.f32 %v509_v37, %v449_v36 }
 0x14e   : > { %v319_v40 = vpop.f32.mrf.mxu0 }
 0x14f   : > { %v379_v41 = vadd.f32 %v378_v35, %v319_v40  ;;  %v546_v42 = vadd.f32 %v533_v38, %v518_v39 }
 0x151   : > { %v550_v44 = vmax.f32 %v546_v42, 0.0  ;;  %v450_v45 = vadd.f32 %v443_v43, %v379_v41 }
 0x153   : > { %554 = vst [vmem:[%s989_s27 + $0x8] sm:$0xff] %v550_v44 }
 0x154   : > { %v512_v46 = vpop.f32.mrf.mxu3  ;;  %v445_v54 = vpop.f32.mrf.mxu2 }
 0x155   : > { %v519_v48 = vadd.f32 %v512_v46, %v450_v45 }
 0x156   : > { %v321_v50 = vpop.f32.mrf.mxu0 }
 0x157   : > { %v547_v51 = vadd.f32 %v538_v47, %v519_v48  ;;  %v381_v52 = vadd.f32 %v380_v49, %v321_v50 }
 0x159   : > { %v551_v53 = vmax.f32 %v547_v51, 0.0  ;;  %v451_v55 = vadd.f32 %v445_v54, %v381_v52 }
 0x15b   : > { %555 = vst [vmem:[%s989_s27 + $0x10] sm:$0xff] %v551_v53 }
 0x15c   : > { %v514_v56 = vpop.f32.mrf.mxu3 }
 0x15d   : > { %v520_v57 = vadd.f32 %v514_v56, %v451_v55 }
 0x15f   : > { %v548_v59 = vadd.f32 %v543_v58, %v520_v57 }
 0x161   : > { %v552_v60 = vmax.f32 %v548_v59, 0.0 }
 0x163   : > { %556 = vst [vmem:[%s989_s27 + $0x18] sm:$0xff] %v552_v60 }
 0x164 PF: > { %s13_s14 = sadd.s32 1, %s829_s14   ;;  %s1008_s12 = smov %s825_s13 }
 0x165   : > { %p10_p5 = scmp.ge.s32.totalorder %s13_s14, 4   ;;  %s1009_s13 = smov %s1011_s15 }
 0x167   :  { %12 = sbr.rel (!%p10_p5) target bundleno = 2 (0x2), region = 65 }

</bundles_post_ra>
